<compile_context>
chip_gen: v5e
topology: v5e:2x2
jax: 0.10.0
libtpu: 0.0.40
codegen_flags: <defaults>
</compile_context>

<pallas_src>
import jax
import jax.numpy as jnp
from jax.experimental import pallas as pl
from jax.experimental.pallas import tpu as pltpu


def _pos_enc_kernel(row_ref, col_ref, out_ref, slab_ref):
    # row_ref : (H, D2)        full row-embedding table (VMEM resident)
    # col_ref : (W, D2)        full col-embedding table (VMEM resident)
    # out_ref : (bt, H, W*D)   batch-tile of the flattened, lane-dense output
    # slab_ref: (H, W*D)       VMEM scratch holding the batch-independent slab
    H, D2 = row_ref.shape
    W, _ = col_ref.shape
    D = 2 * D2
    bt = out_ref.shape[0]

    # Build the slab exactly once (first grid step); later steps only replay.
    @pl.when(pl.program_id(0) == 0)
    def _build():
        row_all = row_ref[...]                      # (H, D2)
        for w in range(W):                          # static; traced once only
            base = w * D
            # slab[:, w, :D2] = row_embed ; slab[:, w, D2:] = col_embed[w]
            slab_ref[:, base:base + D2] = row_all
            slab_ref[:, base + D2:base + D] = jnp.broadcast_to(
                col_ref[w:w + 1, :], (H, D2))
        # TODO(synk): if this build ever becomes per-step (e.g. a "parallel"
        # batch axis for v7x megacore), replace the masked-store loop with a
        # fully vectorized tile/reshape build.

    # Steady state: replicate the slab into every batch row of this tile with
    # full-width (lane-dense) stores; the BlockSpec DMA writes back to HBM.
    slab = slab_ref[...]
    for j in range(bt):                             # static; bt is small
        out_ref[j] = slab


def learned_grid_2d_pos_encoding(row_weight, col_weight, B):
    """row_weight: (H, D/2), col_weight: (W, D/2) -> (B, H, W, D)."""
    H, D2 = row_weight.shape
    W, _ = col_weight.shape
    D = 2 * D2
    dtype = row_weight.dtype
    itemsize = jnp.dtype(dtype).itemsize

    slab_bytes = H * W * D * itemsize
    table_bytes = (H + W) * D2 * itemsize
    out_bytes = B * slab_bytes

    # Batch tile: as many whole batches per block as fit a conservative VMEM
    # budget (double-buffered out block + resident scratch slab + tables),
    # sized for the smallest generation (v7x: 64 MiB physical, 32 MiB scoped
    # default).  For the toy shapes bt == B -> grid=(1,): the whole output is
    # a single lane/sublane-dense block and all per-step overhead disappears.
    budget = 24 * 1024 * 1024
    bt = max(1, B)
    while bt > 1 and (3 * bt * slab_bytes + 2 * table_bytes) > budget:
        bt -= 1
    while B % bt != 0:                       # keep the grid exactly divisible
        bt -= 1
    num_steps = B // bt
    # TODO(synk): for a single (H, W*D) slab larger than the budget, add an
    # H-row tile axis as well (not needed for realistic pos-encoding sizes).

    vmem_need = 2 * bt * slab_bytes + slab_bytes + 2 * table_bytes
    vmem_limit = int(min(max(2 * vmem_need, 16 * 1024 * 1024),
                         32 * 1024 * 1024))

    out_flat = pl.pallas_call(
        _pos_enc_kernel,
        out_shape=jax.ShapeDtypeStruct((B, H, W * D), dtype),
        grid_spec=pltpu.PrefetchScalarGridSpec(
            num_scalar_prefetch=0,
            grid=(num_steps,),
            in_specs=[
                pl.BlockSpec((H, D2), lambda i: (0, 0)),   # resident row table
                pl.BlockSpec((W, D2), lambda i: (0, 0)),   # resident col table
            ],
            out_specs=pl.BlockSpec((bt, H, W * D), lambda i: (i, 0, 0)),
            scratch_shapes=[pltpu.VMEM((H, W * D), dtype)],
        ),
        compiler_params=pltpu.CompilerParams(
            # Sequential batch-tile axis: the slab scratch is built at step 0
            # and reused.  NOTE: do NOT flip to "parallel" (v7x megacore)
            # without making the build per-step, or the second TensorCore
            # would read an uninitialized slab.
            dimension_semantics=("arbitrary",),
            vmem_limit_bytes=vmem_limit,
        ),
        cost_estimate=pl.CostEstimate(
            flops=0, transcendentals=0,
            bytes_accessed=out_bytes + table_bytes),
    )(row_weight, col_weight)

    # Free metadata reshape: row-major (B, H, W*D) == (B, H, W, D).
    return out_flat.reshape(B, H, W, D)


def reference(row_weight, col_weight, B):
    H, D2 = row_weight.shape
    W, _ = col_weight.shape
    h_embed = jnp.broadcast_to(row_weight[:, None, :], (H, W, D2))
    w_embed = jnp.broadcast_to(col_weight[None, :, :], (H, W, D2))
    grid = jnp.concatenate([h_embed, w_embed], axis=-1)
    return jnp.broadcast_to(grid[None], (B, H, W, 2 * D2))


if __name__ == "__main__":
    embed_dim, height, width, batch = 32, 16, 16, 2

    key = jax.random.PRNGKey(0)
    k_row, k_col = jax.random.split(key)
    # nn.init.uniform_ -> U[0, 1)
    row_w = jax.random.uniform(k_row, (height, embed_dim // 2), dtype=jnp.float32)
    col_w = jax.random.uniform(k_col, (width, embed_dim // 2), dtype=jnp.float32)

    out = learned_grid_2d_pos_encoding(row_w, col_w, batch)
    out = jax.block_until_ready(out)

    expected = reference(row_w, col_w, batch)
    assert out.shape == (batch, height, width, embed_dim)
    assert jnp.allclose(out, expected), "mismatch vs reference"
    print("KERNEL_OK")
</pallas_src>

<mosaic_0001>
module attributes {stable_mosaic.version = 11 : i64} {
  func.func @_pos_enc_kernel(%arg0: i32, %arg1: memref<16x16xf32, #tpu.memory_space<vmem>>, %arg2: memref<16x16xf32, #tpu.memory_space<vmem>>, %arg3: memref<2x16x512xf32, #tpu.memory_space<vmem>>, %arg4: memref<16x512xf32, #tpu.memory_space<vmem>>) attributes {dimension_semantics = [#tpu.dimension_semantics<arbitrary>], iteration_bounds = array<i64: 1>, scalar_prefetch = 0 : i64, scratch_operands = 1 : i64, tpu.core_type = #tpu.core_type<tc>, window_params = [{pipeline_mode = #tpu.pipeline_mode<synchronous>, transform_indices = @transform_0, window_bounds = array<i64: 16, 16>}, {pipeline_mode = #tpu.pipeline_mode<synchronous>, transform_indices = @transform_1, window_bounds = array<i64: 16, 16>}, {transform_indices = @transform_2, window_bounds = array<i64: 2, 16, 512>}]} {
    %c0_i32 = arith.constant 0 : i32
    %0 = arith.cmpi eq, %arg0, %c0_i32 : i32
    %1 = arith.extui %0 : i1 to i32
    %c0_i32_0 = arith.constant 0 : i32
    %2 = arith.cmpi ne, %1, %c0_i32_0 : i32
    scf.if %2 {
      %c0_7 = arith.constant 0 : index
      %c0_8 = arith.constant 0 : index
      %10 = vector.load %arg1[%c0_7, %c0_8] : memref<16x16xf32, #tpu.memory_space<vmem>>, vector<16x16xf32>
      %c0_9 = arith.constant 0 : index
      %c0_10 = arith.constant 0 : index
      %11 = vector.load %arg4[%c0_9, %c0_10] : memref<16x512xf32, #tpu.memory_space<vmem>>, vector<16x16xf32>
      tpu.vector_store %arg4[%c0_9, %c0_10], %10 {strides = array<i32>} : memref<16x512xf32, #tpu.memory_space<vmem>>, vector<16x16xf32>,
      %c0_11 = arith.constant 0 : index
      %c0_12 = arith.constant 0 : index
      %12 = vector.load %arg2[%c0_11, %c0_12] : memref<16x16xf32, #tpu.memory_space<vmem>>, vector<1x16xf32>
      %13 = vector.shape_cast %12 : vector<1x16xf32> to vector<1x16xf32>
      %14 = vector.broadcast %13 : vector<1x16xf32> to vector<16x16xf32>
      %c0_13 = arith.constant 0 : index
      %c16 = arith.constant 16 : index
      %15 = vector.load %arg4[%c0_13, %c16] : memref<16x512xf32, #tpu.memory_space<vmem>>, vector<16x16xf32>
      tpu.vector_store %arg4[%c0_13, %c16], %14 {strides = array<i32>} : memref<16x512xf32, #tpu.memory_space<vmem>>, vector<16x16xf32>,
      %c0_14 = arith.constant 0 : index
      %c32 = arith.constant 32 : index
      %16 = vector.load %arg4[%c0_14, %c32] : memref<16x512xf32, #tpu.memory_space<vmem>>, vector<16x16xf32>
      tpu.vector_store %arg4[%c0_14, %c32], %10 {strides = array<i32>} : memref<16x512xf32, #tpu.memory_space<vmem>>, vector<16x16xf32>,
      %c1_15 = arith.constant 1 : index
      %c0_16 = arith.constant 0 : index
      %17 = vector.load %arg2[%c1_15, %c0_16] : memref<16x16xf32, #tpu.memory_space<vmem>>, vector<1x16xf32>
      %18 = vector.shape_cast %17 : vector<1x16xf32> to vector<1x16xf32>
      %19 = vector.broadcast %18 : vector<1x16xf32> to vector<16x16xf32>
      %c0_17 = arith.constant 0 : index
      %c48 = arith.constant 48 : index
      %20 = vector.load %arg4[%c0_17, %c48] : memref<16x512xf32, #tpu.memory_space<vmem>>, vector<16x16xf32>
      tpu.vector_store %arg4[%c0_17, %c48], %19 {strides = array<i32>} : memref<16x512xf32, #tpu.memory_space<vmem>>, vector<16x16xf32>,
      %c0_18 = arith.constant 0 : index
      %c64 = arith.constant 64 : index
      %21 = vector.load %arg4[%c0_18, %c64] : memref<16x512xf32, #tpu.memory_space<vmem>>, vector<16x16xf32>
      tpu.vector_store %arg4[%c0_18, %c64], %10 {strides = array<i32>} : memref<16x512xf32, #tpu.memory_space<vmem>>, vector<16x16xf32>,
      %c2 = arith.constant 2 : index
      %c0_19 = arith.constant 0 : index
      %22 = vector.load %arg2[%c2, %c0_19] : memref<16x16xf32, #tpu.memory_space<vmem>>, vector<1x16xf32>
      %23 = vector.shape_cast %22 : vector<1x16xf32> to vector<1x16xf32>
      %24 = vector.broadcast %23 : vector<1x16xf32> to vector<16x16xf32>
      %c0_20 = arith.constant 0 : index
      %c80 = arith.constant 80 : index
      %25 = vector.load %arg4[%c0_20, %c80] : memref<16x512xf32, #tpu.memory_space<vmem>>, vector<16x16xf32>
      tpu.vector_store %arg4[%c0_20, %c80], %24 {strides = array<i32>} : memref<16x512xf32, #tpu.memory_space<vmem>>, vector<16x16xf32>,
      %c0_21 = arith.constant 0 : index
      %c96 = arith.constant 96 : index
      %26 = vector.load %arg4[%c0_21, %c96] : memref<16x512xf32, #tpu.memory_space<vmem>>, vector<16x16xf32>
      tpu.vector_store %arg4[%c0_21, %c96], %10 {strides = array<i32>} : memref<16x512xf32, #tpu.memory_space<vmem>>, vector<16x16xf32>,
      %c3 = arith.constant 3 : index
      %c0_22 = arith.constant 0 : index
      %27 = vector.load %arg2[%c3, %c0_22] : memref<16x16xf32, #tpu.memory_space<vmem>>, vector<1x16xf32>
      %28 = vector.shape_cast %27 : vector<1x16xf32> to vector<1x16xf32>
      %29 = vector.broadcast %28 : vector<1x16xf32> to vector<16x16xf32>
      %c0_23 = arith.constant 0 : index
      %c112 = arith.constant 112 : index
      %30 = vector.load %arg4[%c0_23, %c112] : memref<16x512xf32, #tpu.memory_space<vmem>>, vector<16x16xf32>
      tpu.vector_store %arg4[%c0_23, %c112], %29 {strides = array<i32>} : memref<16x512xf32, #tpu.memory_space<vmem>>, vector<16x16xf32>,
      %c0_24 = arith.constant 0 : index
      %c128 = arith.constant 128 : index
      %31 = vector.load %arg4[%c0_24, %c128] : memref<16x512xf32, #tpu.memory_space<vmem>>, vector<16x16xf32>
      tpu.vector_store %arg4[%c0_24, %c128], %10 {strides = array<i32>} : memref<16x512xf32, #tpu.memory_space<vmem>>, vector<16x16xf32>,
      %c4 = arith.constant 4 : index
      %c0_25 = arith.constant 0 : index
      %32 = vector.load %arg2[%c4, %c0_25] : memref<16x16xf32, #tpu.memory_space<vmem>>, vector<1x16xf32>
      %33 = vector.shape_cast %32 : vector<1x16xf32> to vector<1x16xf32>
      %34 = vector.broadcast %33 : vector<1x16xf32> to vector<16x16xf32>
      %c0_26 = arith.constant 0 : index
      %c144 = arith.constant 144 : index
      %35 = vector.load %arg4[%c0_26, %c144] : memref<16x512xf32, #tpu.memory_space<vmem>>, vector<16x16xf32>
      tpu.vector_store %arg4[%c0_26, %c144], %34 {strides = array<i32>} : memref<16x512xf32, #tpu.memory_space<vmem>>, vector<16x16xf32>,
      %c0_27 = arith.constant 0 : index
      %c160 = arith.constant 160 : index
      %36 = vector.load %arg4[%c0_27, %c160] : memref<16x512xf32, #tpu.memory_space<vmem>>, vector<16x16xf32>
      tpu.vector_store %arg4[%c0_27, %c160], %10 {strides = array<i32>} : memref<16x512xf32, #tpu.memory_space<vmem>>, vector<16x16xf32>,
      %c5 = arith.constant 5 : index
      %c0_28 = arith.constant 0 : index
      %37 = vector.load %arg2[%c5, %c0_28] : memref<16x16xf32, #tpu.memory_space<vmem>>, vector<1x16xf32>
      %38 = vector.shape_cast %37 : vector<1x16xf32> to vector<1x16xf32>
      %39 = vector.broadcast %38 : vector<1x16xf32> to vector<16x16xf32>
      %c0_29 = arith.constant 0 : index
      %c176 = arith.constant 176 : index
      %40 = vector.load %arg4[%c0_29, %c176] : memref<16x512xf32, #tpu.memory_space<vmem>>, vector<16x16xf32>
      tpu.vector_store %arg4[%c0_29, %c176], %39 {strides = array<i32>} : memref<16x512xf32, #tpu.memory_space<vmem>>, vector<16x16xf32>,
      %c0_30 = arith.constant 0 : index
      %c192 = arith.constant 192 : index
      %41 = vector.load %arg4[%c0_30, %c192] : memref<16x512xf32, #tpu.memory_space<vmem>>, vector<16x16xf32>
      tpu.vector_store %arg4[%c0_30, %c192], %10 {strides = array<i32>} : memref<16x512xf32, #tpu.memory_space<vmem>>, vector<16x16xf32>,
      %c6 = arith.constant 6 : index
      %c0_31 = arith.constant 0 : index
      %42 = vector.load %arg2[%c6, %c0_31] : memref<16x16xf32, #tpu.memory_space<vmem>>, vector<1x16xf32>
      %43 = vector.shape_cast %42 : vector<1x16xf32> to vector<1x16xf32>
      %44 = vector.broadcast %43 : vector<1x16xf32> to vector<16x16xf32>
      %c0_32 = arith.constant 0 : index
      %c208 = arith.constant 208 : index
      %45 = vector.load %arg4[%c0_32, %c208] : memref<16x512xf32, #tpu.memory_space<vmem>>, vector<16x16xf32>
      tpu.vector_store %arg4[%c0_32, %c208], %44 {strides = array<i32>} : memref<16x512xf32, #tpu.memory_space<vmem>>, vector<16x16xf32>,
      %c0_33 = arith.constant 0 : index
      %c224 = arith.constant 224 : index
      %46 = vector.load %arg4[%c0_33, %c224] : memref<16x512xf32, #tpu.memory_space<vmem>>, vector<16x16xf32>
      tpu.vector_store %arg4[%c0_33, %c224], %10 {strides = array<i32>} : memref<16x512xf32, #tpu.memory_space<vmem>>, vector<16x16xf32>,
      %c7 = arith.constant 7 : index
      %c0_34 = arith.constant 0 : index
      %47 = vector.load %arg2[%c7, %c0_34] : memref<16x16xf32, #tpu.memory_space<vmem>>, vector<1x16xf32>
      %48 = vector.shape_cast %47 : vector<1x16xf32> to vector<1x16xf32>
      %49 = vector.broadcast %48 : vector<1x16xf32> to vector<16x16xf32>
      %c0_35 = arith.constant 0 : index
      %c240 = arith.constant 240 : index
      %50 = vector.load %arg4[%c0_35, %c240] : memref<16x512xf32, #tpu.memory_space<vmem>>, vector<16x16xf32>
      tpu.vector_store %arg4[%c0_35, %c240], %49 {strides = array<i32>} : memref<16x512xf32, #tpu.memory_space<vmem>>, vector<16x16xf32>,
      %c0_36 = arith.constant 0 : index
      %c256 = arith.constant 256 : index
      %51 = vector.load %arg4[%c0_36, %c256] : memref<16x512xf32, #tpu.memory_space<vmem>>, vector<16x16xf32>
      tpu.vector_store %arg4[%c0_36, %c256], %10 {strides = array<i32>} : memref<16x512xf32, #tpu.memory_space<vmem>>, vector<16x16xf32>,
      %c8 = arith.constant 8 : index
      %c0_37 = arith.constant 0 : index
      %52 = vector.load %arg2[%c8, %c0_37] : memref<16x16xf32, #tpu.memory_space<vmem>>, vector<1x16xf32>
      %53 = vector.shape_cast %52 : vector<1x16xf32> to vector<1x16xf32>
      %54 = vector.broadcast %53 : vector<1x16xf32> to vector<16x16xf32>
      %c0_38 = arith.constant 0 : index
      %c272 = arith.constant 272 : index
      %55 = vector.load %arg4[%c0_38, %c272] : memref<16x512xf32, #tpu.memory_space<vmem>>, vector<16x16xf32>
      tpu.vector_store %arg4[%c0_38, %c272], %54 {strides = array<i32>} : memref<16x512xf32, #tpu.memory_space<vmem>>, vector<16x16xf32>,
      %c0_39 = arith.constant 0 : index
      %c288 = arith.constant 288 : index
      %56 = vector.load %arg4[%c0_39, %c288] : memref<16x512xf32, #tpu.memory_space<vmem>>, vector<16x16xf32>
      tpu.vector_store %arg4[%c0_39, %c288], %10 {strides = array<i32>} : memref<16x512xf32, #tpu.memory_space<vmem>>, vector<16x16xf32>,
      %c9 = arith.constant 9 : index
      %c0_40 = arith.constant 0 : index
      %57 = vector.load %arg2[%c9, %c0_40] : memref<16x16xf32, #tpu.memory_space<vmem>>, vector<1x16xf32>
      %58 = vector.shape_cast %57 : vector<1x16xf32> to vector<1x16xf32>
      %59 = vector.broadcast %58 : vector<1x16xf32> to vector<16x16xf32>
      %c0_41 = arith.constant 0 : index
      %c304 = arith.constant 304 : index
      %60 = vector.load %arg4[%c0_41, %c304] : memref<16x512xf32, #tpu.memory_space<vmem>>, vector<16x16xf32>
      tpu.vector_store %arg4[%c0_41, %c304], %59 {strides = array<i32>} : memref<16x512xf32, #tpu.memory_space<vmem>>, vector<16x16xf32>,
      %c0_42 = arith.constant 0 : index
      %c320 = arith.constant 320 : index
      %61 = vector.load %arg4[%c0_42, %c320] : memref<16x512xf32, #tpu.memory_space<vmem>>, vector<16x16xf32>
      tpu.vector_store %arg4[%c0_42, %c320], %10 {strides = array<i32>} : memref<16x512xf32, #tpu.memory_space<vmem>>, vector<16x16xf32>,
      %c10 = arith.constant 10 : index
      %c0_43 = arith.constant 0 : index
      %62 = vector.load %arg2[%c10, %c0_43] : memref<16x16xf32, #tpu.memory_space<vmem>>, vector<1x16xf32>
      %63 = vector.shape_cast %62 : vector<1x16xf32> to vector<1x16xf32>
      %64 = vector.broadcast %63 : vector<1x16xf32> to vector<16x16xf32>
      %c0_44 = arith.constant 0 : index
      %c336 = arith.constant 336 : index
      %65 = vector.load %arg4[%c0_44, %c336] : memref<16x512xf32, #tpu.memory_space<vmem>>, vector<16x16xf32>
      tpu.vector_store %arg4[%c0_44, %c336], %64 {strides = array<i32>} : memref<16x512xf32, #tpu.memory_space<vmem>>, vector<16x16xf32>,
      %c0_45 = arith.constant 0 : index
      %c352 = arith.constant 352 : index
      %66 = vector.load %arg4[%c0_45, %c352] : memref<16x512xf32, #tpu.memory_space<vmem>>, vector<16x16xf32>
      tpu.vector_store %arg4[%c0_45, %c352], %10 {strides = array<i32>} : memref<16x512xf32, #tpu.memory_space<vmem>>, vector<16x16xf32>,
      %c11 = arith.constant 11 : index
      %c0_46 = arith.constant 0 : index
      %67 = vector.load %arg2[%c11, %c0_46] : memref<16x16xf32, #tpu.memory_space<vmem>>, vector<1x16xf32>
      %68 = vector.shape_cast %67 : vector<1x16xf32> to vector<1x16xf32>
      %69 = vector.broadcast %68 : vector<1x16xf32> to vector<16x16xf32>
      %c0_47 = arith.constant 0 : index
      %c368 = arith.constant 368 : index
      %70 = vector.load %arg4[%c0_47, %c368] : memref<16x512xf32, #tpu.memory_space<vmem>>, vector<16x16xf32>
      tpu.vector_store %arg4[%c0_47, %c368], %69 {strides = array<i32>} : memref<16x512xf32, #tpu.memory_space<vmem>>, vector<16x16xf32>,
      %c0_48 = arith.constant 0 : index
      %c384 = arith.constant 384 : index
      %71 = vector.load %arg4[%c0_48, %c384] : memref<16x512xf32, #tpu.memory_space<vmem>>, vector<16x16xf32>
      tpu.vector_store %arg4[%c0_48, %c384], %10 {strides = array<i32>} : memref<16x512xf32, #tpu.memory_space<vmem>>, vector<16x16xf32>,
      %c12 = arith.constant 12 : index
      %c0_49 = arith.constant 0 : index
      %72 = vector.load %arg2[%c12, %c0_49] : memref<16x16xf32, #tpu.memory_space<vmem>>, vector<1x16xf32>
      %73 = vector.shape_cast %72 : vector<1x16xf32> to vector<1x16xf32>
      %74 = vector.broadcast %73 : vector<1x16xf32> to vector<16x16xf32>
      %c0_50 = arith.constant 0 : index
      %c400 = arith.constant 400 : index
      %75 = vector.load %arg4[%c0_50, %c400] : memref<16x512xf32, #tpu.memory_space<vmem>>, vector<16x16xf32>
      tpu.vector_store %arg4[%c0_50, %c400], %74 {strides = array<i32>} : memref<16x512xf32, #tpu.memory_space<vmem>>, vector<16x16xf32>,
      %c0_51 = arith.constant 0 : index
      %c416 = arith.constant 416 : index
      %76 = vector.load %arg4[%c0_51, %c416] : memref<16x512xf32, #tpu.memory_space<vmem>>, vector<16x16xf32>
      tpu.vector_store %arg4[%c0_51, %c416], %10 {strides = array<i32>} : memref<16x512xf32, #tpu.memory_space<vmem>>, vector<16x16xf32>,
      %c13 = arith.constant 13 : index
      %c0_52 = arith.constant 0 : index
      %77 = vector.load %arg2[%c13, %c0_52] : memref<16x16xf32, #tpu.memory_space<vmem>>, vector<1x16xf32>
      %78 = vector.shape_cast %77 : vector<1x16xf32> to vector<1x16xf32>
      %79 = vector.broadcast %78 : vector<1x16xf32> to vector<16x16xf32>
      %c0_53 = arith.constant 0 : index
      %c432 = arith.constant 432 : index
      %80 = vector.load %arg4[%c0_53, %c432] : memref<16x512xf32, #tpu.memory_space<vmem>>, vector<16x16xf32>
      tpu.vector_store %arg4[%c0_53, %c432], %79 {strides = array<i32>} : memref<16x512xf32, #tpu.memory_space<vmem>>, vector<16x16xf32>,
      %c0_54 = arith.constant 0 : index
      %c448 = arith.constant 448 : index
      %81 = vector.load %arg4[%c0_54, %c448] : memref<16x512xf32, #tpu.memory_space<vmem>>, vector<16x16xf32>
      tpu.vector_store %arg4[%c0_54, %c448], %10 {strides = array<i32>} : memref<16x512xf32, #tpu.memory_space<vmem>>, vector<16x16xf32>,
      %c14 = arith.constant 14 : index
      %c0_55 = arith.constant 0 : index
      %82 = vector.load %arg2[%c14, %c0_55] : memref<16x16xf32, #tpu.memory_space<vmem>>, vector<1x16xf32>
      %83 = vector.shape_cast %82 : vector<1x16xf32> to vector<1x16xf32>
      %84 = vector.broadcast %83 : vector<1x16xf32> to vector<16x16xf32>
      %c0_56 = arith.constant 0 : index
      %c464 = arith.constant 464 : index
      %85 = vector.load %arg4[%c0_56, %c464] : memref<16x512xf32, #tpu.memory_space<vmem>>, vector<16x16xf32>
      tpu.vector_store %arg4[%c0_56, %c464], %84 {strides = array<i32>} : memref<16x512xf32, #tpu.memory_space<vmem>>, vector<16x16xf32>,
      %c0_57 = arith.constant 0 : index
      %c480 = arith.constant 480 : index
      %86 = vector.load %arg4[%c0_57, %c480] : memref<16x512xf32, #tpu.memory_space<vmem>>, vector<16x16xf32>
      tpu.vector_store %arg4[%c0_57, %c480], %10 {strides = array<i32>} : memref<16x512xf32, #tpu.memory_space<vmem>>, vector<16x16xf32>,
      %c15 = arith.constant 15 : index
      %c0_58 = arith.constant 0 : index
      %87 = vector.load %arg2[%c15, %c0_58] : memref<16x16xf32, #tpu.memory_space<vmem>>, vector<1x16xf32>
      %88 = vector.shape_cast %87 : vector<1x16xf32> to vector<1x16xf32>
      %89 = vector.broadcast %88 : vector<1x16xf32> to vector<16x16xf32>
      %c0_59 = arith.constant 0 : index
      %c496 = arith.constant 496 : index
      %90 = vector.load %arg4[%c0_59, %c496] : memref<16x512xf32, #tpu.memory_space<vmem>>, vector<16x16xf32>
      tpu.vector_store %arg4[%c0_59, %c496], %89 {strides = array<i32>} : memref<16x512xf32, #tpu.memory_space<vmem>>, vector<16x16xf32>,
    } else {
    }
    %c0 = arith.constant 0 : index
    %c0_1 = arith.constant 0 : index
    %3 = vector.load %arg4[%c0, %c0_1] : memref<16x512xf32, #tpu.memory_space<vmem>>, vector<16x512xf32>
    %c0_2 = arith.constant 0 : index
    %c0_3 = arith.constant 0 : index
    %c0_4 = arith.constant 0 : index
    %4 = vector.load %arg3[%c0_2, %c0_3, %c0_4] : memref<2x16x512xf32, #tpu.memory_space<vmem>>, vector<1x16x512xf32>
    %5 = vector.shape_cast %4 : vector<1x16x512xf32> to vector<16x512xf32>
    %6 = vector.shape_cast %3 : vector<16x512xf32> to vector<1x16x512xf32>
    tpu.vector_store %arg3[%c0_2, %c0_3, %c0_4], %6 {strides = array<i32>} : memref<2x16x512xf32, #tpu.memory_space<vmem>>, vector<1x16x512xf32>,
    %c1 = arith.constant 1 : index
    %c0_5 = arith.constant 0 : index
    %c0_6 = arith.constant 0 : index
    %7 = vector.load %arg3[%c1, %c0_5, %c0_6] : memref<2x16x512xf32, #tpu.memory_space<vmem>>, vector<1x16x512xf32>
    %8 = vector.shape_cast %7 : vector<1x16x512xf32> to vector<16x512xf32>
    %9 = vector.shape_cast %3 : vector<16x512xf32> to vector<1x16x512xf32>
    tpu.vector_store %arg3[%c1, %c0_5, %c0_6], %9 {strides = array<i32>} : memref<2x16x512xf32, #tpu.memory_space<vmem>>, vector<1x16x512xf32>,
    return
  }
  func.func @transform_0(%arg0: i32) -> (i32, i32) {
    %c0_i32 = arith.constant 0 : i32
    %c0_i32_0 = arith.constant 0 : i32
    %c0_i32_1 = arith.constant 0 : i32
    return %c0_i32, %c0_i32_0 : i32, i32
  }
  func.func @transform_1(%arg0: i32) -> (i32, i32) {
    %c0_i32 = arith.constant 0 : i32
    %c0_i32_0 = arith.constant 0 : i32
    %c0_i32_1 = arith.constant 0 : i32
    return %c0_i32, %c0_i32_0 : i32, i32
  }
  func.func @transform_2(%arg0: i32) -> (i32, i32, i32) {
    %c0_i32 = arith.constant 0 : i32
    %c0_i32_0 = arith.constant 0 : i32
    %c0_i32_1 = arith.constant 0 : i32
    return %arg0, %c0_i32, %c0_i32_0 : i32, i32, i32
  }
}

</mosaic_0001>

<bundles_post_ra>
// kernel: tpu_custom_call.1
= control target key start
LH: loop header
LB: loop body
LE: loop exit
PB: predicated region body
PF: predicated region fallthrough
CT: control target
= control target key end

     0   :  { %7 = vsyncpa [#allocation4], 0  ;;  %s486_s0 = inlined_call_operand.hbm [shape: f32[16,16], index: 0, kind: input, shape index: {}]   ;;  %s487_s1 = inlined_call_operand.hbm [shape: f32[16,16], index: 1, kind: input, shape index: {}]   ;;  %s488_s2 = inlined_call_operand.hbm [shape: f32[2,16,512], index: 2, kind: output, shape index: {}]  }
   0x1   :  { %8 = vsyncpa [#allocation7], 0 }
   0x2   :  { %9 = vsyncpa [#allocation5], 0  ;;  %s14_s11 = sshll.u32 %s486_s0, 4  ;;  %s390_s12 = smov [#allocation3]   ;;  %s15_s11 = int_to_ptr.hbm [resolvable:$true] %s14_s11 }
   0x3   :  { %s16_s13 = sshll.u32 %s390_s12, 4  ;;  %s27_s16 = sshll.u32 %s487_s1, 4  ;;  %s17_s13 = int_to_ptr.vmem [resolvable:$true] %s16_s13  ;;  %s28_s16 = int_to_ptr.hbm [resolvable:$true] %s27_s16 }
   0x4   :  { %s391_s17 = smov 128   ;;  %s392_s18 = smov 8  }
   0x5   :  { %22 = dma.hbm_to_vmem [thread:$0]  %s15_s11, 256, %s17_s13, [#allocation4], %s391_s17, %s391_s17, %s392_s18  }
   0x6   :  { %s393_s19 = smov [#allocation6]  }
   0x7   :  { %s29_s20 = sshll.u32 %s393_s19, 4  ;;  %s30_s20 = int_to_ptr.vmem [resolvable:$true] %s29_s20 }
   0x8   :  { %35 = dma.hbm_to_vmem [thread:$0]  %s28_s16, 256, %s30_s20, [#allocation7], %s391_s17, %s391_s17, %s392_s18  }
   0x9   :  { %384 = dma.done.wait [#allocation4], 256  }
   0xa   :  { %385 = vsyncadd [#allocation4], 4294967040 }
   0xb   :  { %386 = dma.done.wait [#allocation7], 256  }
   0xc   :  { %387 = vsyncadd [#allocation7], 4294967040  ;;  %v48_v0 = vld [vmem:[#allocation3] sm:$0xff]  ;;  %v49_v1 = vld [vmem:[#allocation3 + $0x8] sm:$0xff]  ;;  %s394_s0 = smov 32   ;;  %s395_s1 = smov 16  }
   0xd   :  { %64 = vrot.lane.b32.xlu0 %v48_v0, %s394_s0  ;;  %66 = vrot.lane.b32.xlu1 %v49_v1, %s394_s0  ;;  %v297_v2 = vld [vmem:[#allocation6 + $0x4] ss:$0 sm:$0xff]  ;;  %v296_v3 = vld [vmem:[#allocation6] ss:$0 sm:$0xff]  ;;  %v298_v4 = vld [vmem:[#allocation6 + $0x1] ss:$0 sm:$0xff] }
   0xe   :  { %123 = vrot.lane.b32.xlu2 %v297_v2, %s395_s1  ;;  %v300_v5 = vld [vmem:[#allocation6 + $0x8] ss:$0 sm:$0xff]  ;;  %s396_s21 = smov 48   ;;  %v299_v6 = vld [vmem:[#allocation6 + $0xc] ss:$0 sm:$0xff]  ;;  %s397_s22 = smov 64  }
   0xf   :  { %v301_v7 = vld [vmem:[#allocation6 + $0x5] ss:$0 sm:$0xff]  ;;  %v306_v8 = vld [vmem:[#allocation6 + $0x9] ss:$0 sm:$0xff]  ;;  %v302_v9 = vld [vmem:[#allocation6 + $0xd] ss:$0 sm:$0xff] }
  0x10   :  { %vm50_vm0 = vcmask 130048   ;;  %v303_v10 = vld [vmem:[#allocation6 + $0x2] ss:$0 sm:$0xff]  ;;  %v304_v11 = vld [vmem:[#allocation6 + $0x6] ss:$0 sm:$0xff]  ;;  %s398_s23 = smov 80  }
  0x11   :  { %118 = vst.msk [vmem:[#allocation2 + $0x8] sm:$0xff] %vm50_vm0, %v48_v0  ;;  %v310_v12 = vld [vmem:[#allocation6 + $0xa] ss:$0 sm:$0xff]  ;;  %v305_v13 = vld [vmem:[#allocation6 + $0xe] ss:$0 sm:$0xff]  ;;  %s399_s24 = smov 96  }
  0x12   :  { %119 = vst.msk [vmem:[#allocation2 + $0x28] sm:$0xff] %vm50_vm0, %v49_v1  ;;  %v307_v14 = vld [vmem:[#allocation6 + $0x3] ss:$0 sm:$0xff]  ;;  %v308_v15 = vld [vmem:[#allocation6 + $0x7] ss:$0 sm:$0xff]  ;;  %s400_s25 = smov 112  }
  0x13   :  { %51 = vst.msk [vmem:[#allocation2] sm:$0xff] %vm50_vm0, %v48_v0  ;;  %v311_v16 = vld [vmem:[#allocation6 + $0xb] ss:$0 sm:$0xff]  ;;  %v309_v17 = vld [vmem:[#allocation6 + $0xf] ss:$0 sm:$0xff]  ;;  %vm59_vm1 = vcmask 261248  }
  0x14   :  { %52 = vst.msk [vmem:[#allocation2 + $0x20] sm:$0xff] %vm50_vm0, %v49_v1  ;;  %vm70_vm2 = vcmask 392448   ;;  %vm79_vm3 = vcmask 523648   ;;  %vm88_vm4 = vcmask 654848   ;;  %vm97_vm5 = vcmask 786048   ;;  %s401_s26 = smov [#allocation8]  }
  0x15   :  { %56 = vrot.lane.b32.xlu0 %v296_v3, %s395_s1  ;;  %76 = vrot.lane.b32.xlu1 %v298_v4, %s396_s21  ;;  %158 = vst.msk [vmem:[#allocation2 + $0x10] sm:$0xff] %vm50_vm0, %v48_v0  ;;  %vm106_vm6 = vcmask 917248   ;;  %vm115_vm7 = vcmask 1048448   ;;  %s267_s27 = sshll.u32 %s401_s26, 4  ;;  %s269_s30 = sshll.u32 %s488_s2, 4  ;;  %s268_s27 = int_to_ptr.vmem [resolvable:$true] %s267_s27  ;;  %s270_s30 = int_to_ptr.hbm [resolvable:$true] %s269_s30 }
  0x16   :  { %163 = vrot.lane.b32.xlu2 %v300_v5, %s395_s1  ;;  %159 = vst.msk [vmem:[#allocation2 + $0x30] sm:$0xff] %vm50_vm0, %v49_v1  ;;  %s402_s3 = smov 512  }
  0x17   :  { %198 = vst.msk [vmem:[#allocation2 + $0x18] sm:$0xff] %vm50_vm0, %v48_v0 }
  0x18   :  { %199 = vst.msk [vmem:[#allocation2 + $0x38] sm:$0xff] %vm50_vm0, %v49_v1 }
  0x1d   :  { %203 = vrot.lane.b32.xlu0 %v299_v6, %s395_s1  ;;  %133 = vrot.lane.b32.xlu1 %v301_v7, %s396_s21 }
  0x1e   :  { %173 = vrot.lane.b32.xlu2 %v306_v8, %s396_s21 }
  0x25   :  { %213 = vrot.lane.b32.xlu0 %v302_v9, %s396_s21  ;;  %82 = vrot.lane.b32.xlu1 %v48_v0, %s397_s22 }
  0x26   :  { %84 = vrot.lane.b32.xlu2 %v49_v1, %s397_s22 }
  0x2d   :  { %94 = vrot.lane.b32.xlu0 %v303_v10, %s398_s23  ;;  %143 = vrot.lane.b32.xlu1 %v304_v11, %s398_s23 }
  0x2e   :  { %183 = vrot.lane.b32.xlu2 %v310_v12, %s398_s23 }
  0x35   :  { %223 = vrot.lane.b32.xlu0 %v305_v13, %s398_s23  ;;  %100 = vrot.lane.b32.xlu1 %v48_v0, %s399_s24 }
  0x36   :  { %102 = vrot.lane.b32.xlu2 %v49_v1, %s399_s24 }
  0x3d   :  { %112 = vrot.lane.b32.xlu0 %v307_v14, %s400_s25  ;;  %153 = vrot.lane.b32.xlu1 %v308_v15, %s400_s25 }
  0x3e   :  { %193 = vrot.lane.b32.xlu2 %v311_v16, %s400_s25 }
  0x45   :  { %233 = vrot.lane.b32.xlu0 %v309_v17, %s400_s25 }
  0x68   :  { %v124_v18 = vpop.permute.xlu2 %123 }
  0x69   :  { %126 = vst.msk [vmem:[#allocation2 + $0x8] sm:$0xff] %vm59_vm1, %v124_v18 }
  0x6a   :  { %127 = vst.msk [vmem:[#allocation2 + $0x28] sm:$0xff] %vm59_vm1, %v124_v18 }
  0x70   :  { %v164_v19 = vpop.permute.xlu2 %163 }
  0x71   :  { %166 = vst.msk [vmem:[#allocation2 + $0x10] sm:$0xff] %vm59_vm1, %v164_v19 }
  0x72   :  { %167 = vst.msk [vmem:[#allocation2 + $0x30] sm:$0xff] %vm59_vm1, %v164_v19 }
  0x78   :  { %v174_v20 = vpop.permute.xlu2 %173 }
  0x7f   :  { %v65_v21 = vpop.permute.xlu0 %64  ;;  %v67_v22 = vpop.permute.xlu1 %66 }
  0x80   :  { %128 = vst.msk [vmem:[#allocation2 + $0x8] sm:$0xff] %vm70_vm2, %v65_v21  ;;  %v85_v23 = vpop.permute.xlu2 %84 }
  0x81   :  { %168 = vst.msk [vmem:[#allocation2 + $0x10] sm:$0xff] %vm70_vm2, %v65_v21 }
  0x82   :  { %129 = vst.msk [vmem:[#allocation2 + $0x28] sm:$0xff] %vm70_vm2, %v67_v22 }
  0x83   :  { %169 = vst.msk [vmem:[#allocation2 + $0x30] sm:$0xff] %vm70_vm2, %v67_v22 }
  0x84   :  { %176 = vst.msk [vmem:[#allocation2 + $0x10] sm:$0xff] %vm79_vm3, %v174_v20 }
  0x85   :  { %177 = vst.msk [vmem:[#allocation2 + $0x30] sm:$0xff] %vm79_vm3, %v174_v20 }
  0x86   :  { %179 = vst.msk [vmem:[#allocation2 + $0x30] sm:$0xff] %vm88_vm4, %v85_v23 }
  0x87   :  { %v57_v24 = vpop.permute.xlu0 %56  ;;  %v77_v25 = vpop.permute.xlu1 %76 }
  0x88   :  { %60 = vst.msk [vmem:[#allocation2] sm:$0xff] %vm59_vm1, %v57_v24  ;;  %v184_v26 = vpop.permute.xlu2 %183 }
  0x89   :  { %61 = vst.msk [vmem:[#allocation2 + $0x20] sm:$0xff] %vm59_vm1, %v57_v24 }
  0x8a   :  { %71 = vst.msk [vmem:[#allocation2] sm:$0xff] %vm70_vm2, %v65_v21 }
  0x8b   :  { %72 = vst.msk [vmem:[#allocation2 + $0x20] sm:$0xff] %vm70_vm2, %v67_v22 }
  0x8c   :  { %80 = vst.msk [vmem:[#allocation2] sm:$0xff] %vm79_vm3, %v77_v25 }
  0x8d   :  { %81 = vst.msk [vmem:[#allocation2 + $0x20] sm:$0xff] %vm79_vm3, %v77_v25 }
  0x8e   :  { %90 = vst.msk [vmem:[#allocation2 + $0x20] sm:$0xff] %vm88_vm4, %v85_v23 }
  0x8f   :  { %v204_v27 = vpop.permute.xlu0 %203  ;;  %v134_v28 = vpop.permute.xlu1 %133  ;;  %187 = vst.msk [vmem:[#allocation2 + $0x30] sm:$0xff] %vm97_vm5, %v184_v26 }
  0x90   :  { %206 = vst.msk [vmem:[#allocation2 + $0x18] sm:$0xff] %vm59_vm1, %v204_v27  ;;  %v103_v29 = vpop.permute.xlu2 %102 }
  0x91   :  { %207 = vst.msk [vmem:[#allocation2 + $0x38] sm:$0xff] %vm59_vm1, %v204_v27 }
  0x92   :  { %208 = vst.msk [vmem:[#allocation2 + $0x18] sm:$0xff] %vm70_vm2, %v65_v21 }
  0x93   :  { %209 = vst.msk [vmem:[#allocation2 + $0x38] sm:$0xff] %vm70_vm2, %v67_v22 }
  0x94   :  { %136 = vst.msk [vmem:[#allocation2 + $0x8] sm:$0xff] %vm79_vm3, %v134_v28 }
  0x95   :  { %137 = vst.msk [vmem:[#allocation2 + $0x28] sm:$0xff] %vm79_vm3, %v134_v28 }
  0x96   :  { %139 = vst.msk [vmem:[#allocation2 + $0x28] sm:$0xff] %vm88_vm4, %v85_v23 }
  0x97   :  { %v214_v30 = vpop.permute.xlu0 %213  ;;  %v83_v31 = vpop.permute.xlu1 %82  ;;  %189 = vst.msk [vmem:[#allocation2 + $0x30] sm:$0xff] %vm106_vm6, %v103_v29 }
  0x98   :  { %216 = vst.msk [vmem:[#allocation2 + $0x18] sm:$0xff] %vm79_vm3, %v214_v30  ;;  %v194_v34 = vpop.permute.xlu2 %193 }
  0x99   :  { %217 = vst.msk [vmem:[#allocation2 + $0x38] sm:$0xff] %vm79_vm3, %v214_v30 }
  0x9a   :  { %219 = vst.msk [vmem:[#allocation2 + $0x38] sm:$0xff] %vm88_vm4, %v85_v23 }
  0x9b   :  { %89 = vst.msk [vmem:[#allocation2] sm:$0xff] %vm88_vm4, %v83_v31 }
  0x9c   :  { %138 = vst.msk [vmem:[#allocation2 + $0x8] sm:$0xff] %vm88_vm4, %v83_v31 }
  0x9d   :  { %178 = vst.msk [vmem:[#allocation2 + $0x10] sm:$0xff] %vm88_vm4, %v83_v31 }
  0x9e   :  { %218 = vst.msk [vmem:[#allocation2 + $0x18] sm:$0xff] %vm88_vm4, %v83_v31 }
  0x9f   :  { %v95_v32 = vpop.permute.xlu0 %94  ;;  %186 = vst.msk [vmem:[#allocation2 + $0x10] sm:$0xff] %vm97_vm5, %v184_v26  ;;  %v144_v33 = vpop.permute.xlu1 %143 }
  0xa0   :  { %98 = vst.msk [vmem:[#allocation2] sm:$0xff] %vm97_vm5, %v95_v32 }
  0xa1   :  { %99 = vst.msk [vmem:[#allocation2 + $0x20] sm:$0xff] %vm97_vm5, %v95_v32 }
  0xa2   :  { %146 = vst.msk [vmem:[#allocation2 + $0x8] sm:$0xff] %vm97_vm5, %v144_v33 }
  0xa3   :  { %147 = vst.msk [vmem:[#allocation2 + $0x28] sm:$0xff] %vm97_vm5, %v144_v33 }
  0xa4   :  { %108 = vst.msk [vmem:[#allocation2 + $0x20] sm:$0xff] %vm106_vm6, %v103_v29 }
  0xa5   :  { %149 = vst.msk [vmem:[#allocation2 + $0x28] sm:$0xff] %vm106_vm6, %v103_v29 }
  0xa6   :  { %197 = vst.msk [vmem:[#allocation2 + $0x30] sm:$0xff] %vm115_vm7, %v194_v34 }
  0xa7   :  { %v224_v35 = vpop.permute.xlu0 %223  ;;  %v101_v36 = vpop.permute.xlu1 %100 }
  0xa8   :  { %226 = vst.msk [vmem:[#allocation2 + $0x18] sm:$0xff] %vm97_vm5, %v224_v35 }
  0xa9   :  { %227 = vst.msk [vmem:[#allocation2 + $0x38] sm:$0xff] %vm97_vm5, %v224_v35 }
  0xaa   :  { %229 = vst.msk [vmem:[#allocation2 + $0x38] sm:$0xff] %vm106_vm6, %v103_v29 }
  0xab   :  { %107 = vst.msk [vmem:[#allocation2] sm:$0xff] %vm106_vm6, %v101_v36 }
  0xac   :  { %148 = vst.msk [vmem:[#allocation2 + $0x8] sm:$0xff] %vm106_vm6, %v101_v36 }
  0xad   :  { %188 = vst.msk [vmem:[#allocation2 + $0x10] sm:$0xff] %vm106_vm6, %v101_v36  ;;  %v244_v38 = vld [vmem:[#allocation2 + $0x30] sm:$0xff] }
  0xae   :  { %228 = vst.msk [vmem:[#allocation2 + $0x18] sm:$0xff] %vm106_vm6, %v101_v36 }
  0xaf   :  { %v113_v37 = vpop.permute.xlu0 %112  ;;  %196 = vst.msk [vmem:[#allocation2 + $0x10] sm:$0xff] %vm115_vm7, %v194_v34  ;;  %v154_v39 = vpop.permute.xlu1 %153 }
  0xb0   :  { %116 = vst.msk [vmem:[#allocation2] sm:$0xff] %vm115_vm7, %v113_v37 }
  0xb1   :  { %117 = vst.msk [vmem:[#allocation2 + $0x20] sm:$0xff] %vm115_vm7, %v113_v37 }
  0xb2   :  { %252 = vst [vmem:[#allocation8 + $0x30] sm:$0xff] %v244_v38 }
  0xb3   :  { %261 = vst [vmem:[#allocation8 + $0x70] sm:$0xff] %v244_v38 }
  0xb4   :  { %156 = vst.msk [vmem:[#allocation2 + $0x8] sm:$0xff] %vm115_vm7, %v154_v39 }
  0xb5   :  { %157 = vst.msk [vmem:[#allocation2 + $0x28] sm:$0xff] %vm115_vm7, %v154_v39 }
  0xb6   :  { %v240_v40 = vld [vmem:[#allocation2 + $0x10] sm:$0xff] }
  0xb7   :  { %v238_v41 = vld [vmem:[#allocation2] sm:$0xff]  ;;  %248 = vst [vmem:[#allocation8 + $0x10] sm:$0xff] %v240_v40  ;;  %v234_v45 = vpop.permute.xlu0 %233 }
  0xb8   :  { %v242_v42 = vld [vmem:[#allocation2 + $0x20] sm:$0xff]  ;;  %246 = vst [vmem:[#allocation8] sm:$0xff] %v238_v41 }
  0xb9   :  { %250 = vst [vmem:[#allocation8 + $0x20] sm:$0xff] %v242_v42 }
  0xba   :  { %255 = vst [vmem:[#allocation8 + $0x40] sm:$0xff] %v238_v41 }
  0xbb   :  { %259 = vst [vmem:[#allocation8 + $0x60] sm:$0xff] %v242_v42  ;;  %v239_v43 = vld [vmem:[#allocation2 + $0x8] sm:$0xff] }
  0xbc   :  { %257 = vst [vmem:[#allocation8 + $0x50] sm:$0xff] %v240_v40  ;;  %v243_v44 = vld [vmem:[#allocation2 + $0x28] sm:$0xff] }
  0xbd   :  { %247 = vst [vmem:[#allocation8 + $0x8] sm:$0xff] %v239_v43 }
  0xbe   :  { %251 = vst [vmem:[#allocation8 + $0x28] sm:$0xff] %v243_v44 }
  0xbf   :  { %256 = vst [vmem:[#allocation8 + $0x48] sm:$0xff] %v239_v43 }
  0xc0   :  { %260 = vst [vmem:[#allocation8 + $0x68] sm:$0xff] %v243_v44 }
  0xc1   :  { %236 = vst.msk [vmem:[#allocation2 + $0x18] sm:$0xff] %vm115_vm7, %v234_v45 }
  0xc2   :  { %237 = vst.msk [vmem:[#allocation2 + $0x38] sm:$0xff] %vm115_vm7, %v234_v45 }
  0xc8   :  { %v241_v46 = vld [vmem:[#allocation2 + $0x18] sm:$0xff] }
  0xc9   :  { %v245_v47 = vld [vmem:[#allocation2 + $0x38] sm:$0xff]  ;;  %249 = vst [vmem:[#allocation8 + $0x18] sm:$0xff] %v241_v46 }
  0xca   :  { %253 = vst [vmem:[#allocation8 + $0x38] sm:$0xff] %v245_v47 }
  0xcb   :  { %258 = vst [vmem:[#allocation8 + $0x58] sm:$0xff] %v241_v46 }
  0xcc   :  { %262 = vst [vmem:[#allocation8 + $0x78] sm:$0xff] %v245_v47 }
  0xcd   :  { %275 = dma.vmem_to_hbm [thread:$0]  %s268_s27, 2048, %s270_s30, [#allocation5], %s402_s3, %s402_s3, %s394_s0  }
  0xce   :  { %388 = dma.done.wait [#allocation5], 2048  }
  0xcf   :  { %389 = vsyncadd [#allocation5], 4294965248 }
  0xd0   :  { %280 = vsyncpa [#allocation4], 1 }
  0xd1   :  { %281 = vsyncpa [#allocation7], 1 }
  0xd2   :  { %282 = vsyncpa [#allocation5], 1 }

</bundles_post_ra>
